<compile_context>
chip_gen: v5e
topology: v5e:2x2
jax: 0.10.0
libtpu: 0.0.40
codegen_flags: <defaults>
</compile_context>

<pallas_src>
import functools

import jax
import jax.numpy as jnp
from jax.experimental import pallas as pl
from jax.experimental.pallas import tpu as pltpu

_OUT_W = 8  # lanes written by the kernel; q1 in lane 0, q2 in lane 1.


def _round_up(x, m):
    return ((x + m - 1) // m) * m


def _make_qnet_kernel(state_dim, action_dim, hidden):
    """Build the fused twin-Q kernel with static packing offsets baked in."""
    hidden2 = 2 * hidden
    s8 = _round_up(state_dim, 8)
    a8 = _round_up(action_dim, 8)
    off_w1a = s8
    off_w2 = s8 + a8

    def kernel(state_ref, action_ref, w_ref, b_ref, out_ref):
        st = state_ref[...]                                   # [bb, S]  bf16
        ac = action_ref[...]                                  # [bb, A]  bf16

        # static, sublane-aligned slices into the packed bf16 weight buffer
        w1s = w_ref[0:state_dim, :]                           # [S, 2H]
        w1a = w_ref[off_w1a:off_w1a + action_dim, :]          # [A, 2H]
        w2f = w_ref[off_w2:off_w2 + hidden2, :]               # [2H, 2H] blockdiag

        b1 = b_ref[0:1, :]                                    # [1, 2H] f32
        b2 = b_ref[1:2, :]
        b3 = b_ref[2:3, :]                                    # lanes 0/1 = b3/b6
        w3row = b_ref[3:4, :]                                 # [1, 2H] = w3ᵀ || w6ᵀ

        # layer 1: concat folded into a row-split dot (bf16 in, f32 acc) + ReLU
        h = jnp.dot(st, w1s, preferred_element_type=jnp.float32)
        h = h + jnp.dot(ac, w1a, preferred_element_type=jnp.float32) + b1
        h = jnp.maximum(h, 0.0)

        # layer 2: block-diagonal fused matmul (bf16 in, f32 acc) + ReLU
        h = jnp.dot(h.astype(jnp.bfloat16), w2f,
                    preferred_element_type=jnp.float32) + b2
        h = jnp.maximum(h, 0.0)

        # layer 3: only two outputs -> VPU multiply + lane reduction (no MXU)
        p = h * w3row                                         # [bb, 2H] f32
        q1 = jnp.sum(p[:, :hidden], axis=-1, keepdims=True) + b3[:, 0:1]
        q2 = jnp.sum(p[:, hidden:], axis=-1, keepdims=True) + b3[:, 1:2]
        pad = jnp.zeros((q1.shape[0], _OUT_W - 2), jnp.float32)
        out_ref[...] = jnp.concatenate([q1, q2, pad], axis=-1)

    return kernel


def pack_qnetwork_params(params, state_dim, action_dim, hidden_dim):
    """Fuse/pack per-layer params into one bf16 weight pack + one f32 bias pack."""
    h = hidden_dim
    h2 = 2 * h
    s8 = _round_up(state_dim, 8)
    a8 = _round_up(action_dim, 8)

    # fused layer 1: [S+A, 2H], split rows into state/action blocks
    w1f = jnp.concatenate([params["w1"], params["w4"]], axis=1)
    w1s, w1a = w1f[:state_dim], w1f[state_dim:]

    # fused layer 2: block-diagonal [2H, 2H]
    w2f = jnp.zeros((h2, h2), jnp.float32)
    w2f = w2f.at[:h, :h].set(params["w2"]).at[h:, h:].set(params["w5"])

    # single packed weight buffer (bf16), each block at an 8-aligned row offset
    w_pack = jnp.zeros((s8 + a8 + h2, h2), jnp.float32)
    w_pack = w_pack.at[0:state_dim].set(w1s)
    w_pack = w_pack.at[s8:s8 + action_dim].set(w1a)
    w_pack = w_pack.at[s8 + a8:s8 + a8 + h2].set(w2f)
    w_pack = w_pack.astype(jnp.bfloat16)

    # packed bias buffer [4, 2H] f32; row 3 carries w3ᵀ||w6ᵀ for the VPU layer 3
    b_pack = jnp.zeros((4, h2), jnp.float32)
    b_pack = b_pack.at[0, :h].set(params["b1"][0]).at[0, h:].set(params["b4"][0])
    b_pack = b_pack.at[1, :h].set(params["b2"][0]).at[1, h:].set(params["b5"][0])
    b_pack = b_pack.at[2, 0].set(params["b3"][0, 0])
    b_pack = b_pack.at[2, 1].set(params["b6"][0, 0])
    b_pack = b_pack.at[3, :h].set(params["w3"][:, 0])
    b_pack = b_pack.at[3, h:].set(params["w6"][:, 0])
    return w_pack, b_pack


@functools.partial(jax.jit, static_argnames=("block_batch",))
def qnetwork_forward(state, action, w_pack, b_pack, *, block_batch=4096):
    """Pallas forward of the SAC twin Q-network.

    state:  [B, state_dim]
    action: [B, action_dim]
    w_pack, b_pack: packed params from pack_qnetwork_params.
    Returns (q1, q2), each [B, 1] f32.
    On v7x (2 TensorCores) pass block_batch ≈ round_up(ceil(B/2), 8) for large B.
    """
    state = state.astype(jnp.bfloat16)
    action = action.astype(jnp.bfloat16)
    B, state_dim = state.shape
    action_dim = action.shape[1]
    hidden2 = w_pack.shape[1]
    hidden = hidden2 // 2

    if B <= block_batch:
        bb = B                                   # single grid step
    else:
        bb = max(8, (block_batch // 8) * 8)      # keep (8,128) rule on tiles
    grid = (pl.cdiv(B, bb),)
    kernel = _make_qnet_kernel(state_dim, action_dim, hidden)

    flops = 2 * B * ((state_dim + action_dim) * hidden2 + hidden2 * hidden2 + hidden2)
    bytes_accessed = (B * (state_dim + action_dim) * 2 + w_pack.size * 2
                      + b_pack.size * 4 + B * _OUT_W * 4)

    out = pl.pallas_call(
        kernel,
        out_shape=jax.ShapeDtypeStruct((B, _OUT_W), jnp.float32),
        grid=grid,
        in_specs=[
            pl.BlockSpec((bb, state_dim), lambda i: (i, 0)),
            pl.BlockSpec((bb, action_dim), lambda i: (i, 0)),
            pl.BlockSpec(w_pack.shape, lambda i: (0, 0)),   # VMEM-resident weights
            pl.BlockSpec(b_pack.shape, lambda i: (0, 0)),   # VMEM-resident biases
        ],
        out_specs=pl.BlockSpec((bb, _OUT_W), lambda i: (i, 0)),
        compiler_params=pltpu.CompilerParams(
            dimension_semantics=("parallel",),
            vmem_limit_bytes=32 * 1024 * 1024),
        cost_estimate=pl.CostEstimate(flops=flops, transcendentals=0,
                                      bytes_accessed=bytes_accessed),
    )(state, action, w_pack, b_pack)

    return out[:, 0:1], out[:, 1:2]


def init_qnetwork_params(key, state_dim, action_dim, hidden_dim=32, init_w=0.003):
    """Deterministic init matching PyTorch QNetwork.__init__ semantics.

    nn.Linear default: weight & bias ~ U(-1/sqrt(fan_in), 1/sqrt(fan_in)).
    linear3 / linear6: weight & bias ~ U(-init_w, init_w).
    Weights are stored transposed as [in, out]; biases as [1, out].
    """
    in_dim = state_dim + action_dim
    keys = jax.random.split(key, 12)

    def lin(kw, kb, fan_in, fan_out, bound):
        w = jax.random.uniform(kw, (fan_in, fan_out), jnp.float32, -bound, bound)
        b = jax.random.uniform(kb, (1, fan_out), jnp.float32, -bound, bound)
        return w, b

    w1, b1 = lin(keys[0], keys[1], in_dim, hidden_dim, 1.0 / jnp.sqrt(in_dim))
    w2, b2 = lin(keys[2], keys[3], hidden_dim, hidden_dim, 1.0 / jnp.sqrt(hidden_dim))
    w3, b3 = lin(keys[4], keys[5], hidden_dim, 1, init_w)
    w4, b4 = lin(keys[6], keys[7], in_dim, hidden_dim, 1.0 / jnp.sqrt(in_dim))
    w5, b5 = lin(keys[8], keys[9], hidden_dim, hidden_dim, 1.0 / jnp.sqrt(hidden_dim))
    w6, b6 = lin(keys[10], keys[11], hidden_dim, 1, init_w)

    return dict(w1=w1, b1=b1, w2=w2, b2=b2, w3=w3, b3=b3,
                w4=w4, b4=b4, w5=w5, b5=b5, w6=w6, b6=b6)


def _reference_forward(state, action, p):
    """Pure-JAX f32 reference of the PyTorch forward, for a sanity check."""
    x = jnp.concatenate([state, action], axis=1)
    h = jax.nn.relu(x @ p["w1"] + p["b1"])
    h = jax.nn.relu(h @ p["w2"] + p["b2"])
    q1 = h @ p["w3"] + p["b3"]
    g = jax.nn.relu(x @ p["w4"] + p["b4"])
    g = jax.nn.relu(g @ p["w5"] + p["b5"])
    q2 = g @ p["w6"] + p["b6"]
    return q1, q2


if __name__ == "__main__":
    key = jax.random.PRNGKey(0)
    k_params, k_state, k_action = jax.random.split(key, 3)

    batch = 8
    state_dim = 12
    action_dim = 4
    hidden_dim = 32

    params = init_qnetwork_params(k_params, state_dim, action_dim, hidden_dim)
    w_pack, b_pack = pack_qnetwork_params(params, state_dim, action_dim, hidden_dim)

    state = jax.random.normal(k_state, (batch, state_dim), jnp.float32)
    action = jax.random.normal(k_action, (batch, action_dim), jnp.float32)

    q1, q2 = qnetwork_forward(state, action, w_pack, b_pack)
    q1 = jax.block_until_ready(q1)
    q2 = jax.block_until_ready(q2)

    # sanity check vs. pure-JAX f32 reference of the original (unfused) network
    # (tolerance relaxed because the kernel runs bf16 operands with f32 accum)
    r1, r2 = _reference_forward(state, action, params)
    assert q1.shape == (batch, 1) and q2.shape == (batch, 1)
    assert jnp.allclose(q1, r1, atol=2e-3, rtol=2e-2)
    assert jnp.allclose(q2, r2, atol=2e-3, rtol=2e-2)

    print("KERNEL_OK")
</pallas_src>

<mosaic_0001>
module attributes {stable_mosaic.version = 11 : i64} {
  func.func @kernel(%arg0: i32, %arg1: memref<8x12xbf16, #tpu.memory_space<vmem>>, %arg2: memref<8x4xbf16, #tpu.memory_space<vmem>>, %arg3: memref<88x64xbf16, #tpu.memory_space<vmem>>, %arg4: memref<4x64xf32, #tpu.memory_space<vmem>>, %arg5: memref<8x8xf32, #tpu.memory_space<vmem>>) attributes {dimension_semantics = [#tpu.dimension_semantics<parallel>], iteration_bounds = array<i64: 1>, scalar_prefetch = 0 : i64, scratch_operands = 0 : i64, tpu.core_type = #tpu.core_type<tc>, window_params = [{transform_indices = @transform_0, window_bounds = array<i64: 8, 12>}, {transform_indices = @transform_1, window_bounds = array<i64: 8, 4>}, {pipeline_mode = #tpu.pipeline_mode<synchronous>, transform_indices = @transform_2, window_bounds = array<i64: 88, 64>}, {pipeline_mode = #tpu.pipeline_mode<synchronous>, transform_indices = @transform_3, window_bounds = array<i64: 4, 64>}, {transform_indices = @transform_4, window_bounds = array<i64: 8, 8>}]} {
    %c0 = arith.constant 0 : index
    %c0_0 = arith.constant 0 : index
    %0 = vector.load %arg1[%c0, %c0_0] : memref<8x12xbf16, #tpu.memory_space<vmem>>, vector<8x12xbf16>
    %c0_1 = arith.constant 0 : index
    %c0_2 = arith.constant 0 : index
    %1 = vector.load %arg2[%c0_1, %c0_2] : memref<8x4xbf16, #tpu.memory_space<vmem>>, vector<8x4xbf16>
    %c0_3 = arith.constant 0 : index
    %c0_4 = arith.constant 0 : index
    %2 = vector.load %arg3[%c0_3, %c0_4] : memref<88x64xbf16, #tpu.memory_space<vmem>>, vector<12x64xbf16>
    %c16 = arith.constant 16 : index
    %c0_5 = arith.constant 0 : index
    %3 = vector.load %arg3[%c16, %c0_5] : memref<88x64xbf16, #tpu.memory_space<vmem>>, vector<4x64xbf16>
    %c24 = arith.constant 24 : index
    %c0_6 = arith.constant 0 : index
    %4 = vector.load %arg3[%c24, %c0_6] : memref<88x64xbf16, #tpu.memory_space<vmem>>, vector<64x64xbf16>
    %c0_7 = arith.constant 0 : index
    %c0_8 = arith.constant 0 : index
    %5 = vector.load %arg4[%c0_7, %c0_8] : memref<4x64xf32, #tpu.memory_space<vmem>>, vector<1x64xf32>
    %c1 = arith.constant 1 : index
    %c0_9 = arith.constant 0 : index
    %6 = vector.load %arg4[%c1, %c0_9] : memref<4x64xf32, #tpu.memory_space<vmem>>, vector<1x64xf32>
    %c2 = arith.constant 2 : index
    %c0_10 = arith.constant 0 : index
    %7 = vector.load %arg4[%c2, %c0_10] : memref<4x64xf32, #tpu.memory_space<vmem>>, vector<1x64xf32>
    %c3 = arith.constant 3 : index
    %c0_11 = arith.constant 0 : index
    %8 = vector.load %arg4[%c3, %c0_11] : memref<4x64xf32, #tpu.memory_space<vmem>>, vector<1x64xf32>
    %cst = arith.constant dense<0.000000e+00> : vector<8x64xf32>
    %9 = tpu.matmul %0, %2, %cst {dimension_numbers = #tpu.dot_dimension_numbers<[1], [0], [0], [1], [0, 0, 1, 1], [], []>} : vector<8x12xbf16>, vector<12x64xbf16>, vector<8x64xf32> -> vector<8x64xf32>
    %cst_12 = arith.constant dense<0.000000e+00> : vector<8x64xf32>
    %10 = tpu.matmul %1, %3, %cst_12 {dimension_numbers = #tpu.dot_dimension_numbers<[1], [0], [0], [1], [0, 0, 1, 1], [], []>} : vector<8x4xbf16>, vector<4x64xbf16>, vector<8x64xf32> -> vector<8x64xf32>
    %11 = arith.addf %9, %10 : vector<8x64xf32>
    %12 = vector.broadcast %5 : vector<1x64xf32> to vector<8x64xf32>
    %13 = arith.addf %11, %12 : vector<8x64xf32>
    %cst_13 = arith.constant 0.000000e+00 : f32
    %14 = vector.broadcast %cst_13 : f32 to vector<8x64xf32>
    %15 = arith.maximumf %13, %14 : vector<8x64xf32>
    %16 = arith.truncf %15 : vector<8x64xf32> to vector<8x64xbf16>
    %cst_14 = arith.constant dense<0.000000e+00> : vector<8x64xf32>
    %17 = tpu.matmul %16, %4, %cst_14 {dimension_numbers = #tpu.dot_dimension_numbers<[1], [0], [0], [1], [0, 0, 1, 1], [], []>} : vector<8x64xbf16>, vector<64x64xbf16>, vector<8x64xf32> -> vector<8x64xf32>
    %18 = vector.broadcast %6 : vector<1x64xf32> to vector<8x64xf32>
    %19 = arith.addf %17, %18 : vector<8x64xf32>
    %cst_15 = arith.constant 0.000000e+00 : f32
    %20 = vector.broadcast %cst_15 : f32 to vector<8x64xf32>
    %21 = arith.maximumf %19, %20 : vector<8x64xf32>
    %22 = vector.broadcast %8 : vector<1x64xf32> to vector<8x64xf32>
    %23 = arith.mulf %21, %22 : vector<8x64xf32>
    %24 = vector.extract_strided_slice %23 {offsets = [0, 0], sizes = [8, 32], strides = [1, 1]} : vector<8x64xf32> to vector<8x32xf32>
    %cst_16 = arith.constant dense<0.000000e+00> : vector<8xf32>
    %25 = vector.multi_reduction <add>, %24, %cst_16 [1] : vector<8x32xf32> to vector<8xf32>
    %26 = vector.shape_cast %25 : vector<8xf32> to vector<8x1xf32>
    %27 = vector.extract_strided_slice %7 {offsets = [0, 0], sizes = [1, 1], strides = [1, 1]} : vector<1x64xf32> to vector<1x1xf32>
    %28 = vector.broadcast %27 : vector<1x1xf32> to vector<8x1xf32>
    %29 = arith.addf %26, %28 : vector<8x1xf32>
    %30 = vector.extract_strided_slice %23 {offsets = [0, 32], sizes = [8, 32], strides = [1, 1]} : vector<8x64xf32> to vector<8x32xf32>
    %cst_17 = arith.constant dense<0.000000e+00> : vector<8xf32>
    %31 = vector.multi_reduction <add>, %30, %cst_17 [1] : vector<8x32xf32> to vector<8xf32>
    %32 = vector.shape_cast %31 : vector<8xf32> to vector<8x1xf32>
    %33 = vector.extract_strided_slice %7 {offsets = [0, 1], sizes = [1, 1], strides = [1, 1]} : vector<1x64xf32> to vector<1x1xf32>
    %34 = vector.broadcast %33 : vector<1x1xf32> to vector<8x1xf32>
    %35 = arith.addf %32, %34 : vector<8x1xf32>
    %cst_18 = arith.constant 0.000000e+00 : f32
    %36 = vector.broadcast %cst_18 : f32 to vector<8x6xf32>
    %37 = tpu.concatenate %29, %35, %36 in 1 : vector<8x1xf32>, vector<8x1xf32>, vector<8x6xf32> -> vector<8x8xf32>
    %c0_19 = arith.constant 0 : index
    %c0_20 = arith.constant 0 : index
    %38 = vector.load %arg5[%c0_19, %c0_20] : memref<8x8xf32, #tpu.memory_space<vmem>>, vector<8x8xf32>
    tpu.vector_store %arg5[%c0_19, %c0_20], %37 {strides = array<i32>} : memref<8x8xf32, #tpu.memory_space<vmem>>, vector<8x8xf32>,
    return
  }
  func.func @transform_0(%arg0: i32) -> (i32, i32) {
    %c0_i32 = arith.constant 0 : i32
    %c0_i32_0 = arith.constant 0 : i32
    return %arg0, %c0_i32 : i32, i32
  }
  func.func @transform_1(%arg0: i32) -> (i32, i32) {
    %c0_i32 = arith.constant 0 : i32
    %c0_i32_0 = arith.constant 0 : i32
    return %arg0, %c0_i32 : i32, i32
  }
  func.func @transform_2(%arg0: i32) -> (i32, i32) {
    %c0_i32 = arith.constant 0 : i32
    %c0_i32_0 = arith.constant 0 : i32
    %c0_i32_1 = arith.constant 0 : i32
    return %c0_i32, %c0_i32_0 : i32, i32
  }
  func.func @transform_3(%arg0: i32) -> (i32, i32) {
    %c0_i32 = arith.constant 0 : i32
    %c0_i32_0 = arith.constant 0 : i32
    %c0_i32_1 = arith.constant 0 : i32
    return %c0_i32, %c0_i32_0 : i32, i32
  }
  func.func @transform_4(%arg0: i32) -> (i32, i32) {
    %c0_i32 = arith.constant 0 : i32
    %c0_i32_0 = arith.constant 0 : i32
    return %arg0, %c0_i32 : i32, i32
  }
}

</mosaic_0001>

<bundles_post_ra>
// kernel: qnetwork_forward.1
= control target key start
LH: loop header
LB: loop body
LE: loop exit
PB: predicated region body
PF: predicated region fallthrough
CT: control target
= control target key end

     0   :  { %vm39_vm0 = vcmask 1041408   ;;  %vm65_vm1 = vcmask 1045504   ;;  %vm35_vm2 = vcmask 31744   ;;  %vm61_vm3 = vcmask 97280   ;;  %s188_s10 = smov 96   ;;  %s256_s2 = inlined_call_operand.vmem [shape: bf16[88,64], index: 2, kind: input, shape index: {}]   ;;  %s257_s1 = inlined_call_operand.vmem [shape: bf16[8,4], index: 1, kind: input, shape index: {}]   ;;  %s258_s0 = inlined_call_operand.vmem [shape: bf16[8,12], index: 0, kind: input, shape index: {}]   ;;  %s259_s3 = inlined_call_operand.vmem [shape: f32[4,64], index: 3, kind: input, shape index: {}]   ;;  %s260_s4 = inlined_call_operand.vmem [shape: f32[8,8], index: 4, kind: output, shape index: {}]  }
   0x1   :  { %v22_v0 = vld [vmem:[%s256_s2 + $0x8] sm:$0x3]  ;;  %v158_v1 = vld [vmem:[%s256_s2] sm:$0xf]  ;;  %v178_v2 = vld [vmem:[%s256_s2] sm:$0x30] }
   0x2   :  { %v41_v3 = vsel %vm39_vm0, %v22_v0, 0  ;;  %v159_v4 = vor.u32 %v178_v2, %v158_v1  ;;  %v182_v5 = vld [vmem:[%s256_s2 + $0x24] sm:$0xff]  ;;  %v19_v6 = vld [vmem:[%s257_s1] sm:$0xf]  ;;  %v180_v10 = vld [vmem:[%s256_s2 + $0x14] sm:$0xff]  ;;  %vm111_vm4 = vcmask 523264  }
   0x3   :  { %50 = vmatpush.bf16.msra.mxu0 %v41_v3  ;;  %119 = vmatpush.bf16.msra.mxu2 %v182_v5  ;;  %v18_v8 = vld [vmem:[%s258_s0] sm:$0xf]  ;;  %v179_v11 = vld [vmem:[%s256_s2 + $0xc] sm:$0xff]  ;;  %vm131_vm5 = vcmask 261120   ;;  %vm145_vm6 = vcmask 7168   ;;  %vm147_vm7 = vcmask 15360  }
   0x4   :  { %v67_v7 = vsel %vm65_vm1, %v159_v4, 0  ;;  %v181_v9 = vld [vmem:[%s256_s2 + $0x1c] sm:$0xff]  ;;  %vm149_vm8 = vcmask 64512  }
   0x5   :  { %76 = vmatpush.bf16.msra.mxu1 %v67_v7  ;;  %v184_v13 = vld [vmem:[%s259_s3] ss:$0 sm:$0xff]  ;;  %v185_v21 = vld [vmem:[%s259_s3 + $0x1] ss:$0 sm:$0xff]  ;;  %v186_v24 = vld [vmem:[%s259_s3 + $0x3] ss:$0 sm:$0xff] }
   0x6   :  { %155 = vmatmul.msk.bf16.vlgmr.msra.gmra.mxu0 %vm35_vm2, %v19_v6  ;;  %v187_v31 = vld [vmem:[%s259_s3 + $0x2] ss:$0 sm:$0xff] }
   0x7   :  { %120 = vmatpush.bf16.msra.mxu2 %v181_v9 }
   0x8   :  { %160 = vmatmul.msk.bf16.vlgmr.msra.gmra.mxu1 %vm61_vm3, %v18_v8 }
   0xb   :  { %121 = vmatpush.bf16.msra.mxu2 %v180_v10 }
   0xf   :  { %122 = vmatpush.bf16.msra.mxu2 %v179_v11 }
  0x83   :  { %v52_v12 = vpop.f32.mrf.mxu0 }
  0x85   :  { %v78_v14 = vpop.f32.mrf.mxu1 }
  0x86   :  { %v79_v15 = vadd.f32 %v78_v14, %v52_v12 }
  0x88   :  { %v83_v16 = vadd.f32 %v184_v13, %v79_v15 }
  0x8a   :  { %v84_v17 = vmax.f32 %v83_v16, 0.0 }
  0x8b   :  { %v54_v18 = vpop.f32.mrf.mxu0 }
  0x8c   :  { %v85_v19 = vpack.c.bf16 %v84_v17, %v84_v17 }
  0x8d   :  { %v80_v20 = vpop.f32.mrf.mxu1 }
  0x8e   :  { %177 = vmatmul.msk.bf16.vlgmr.msra.gmra.mxu2 %vm111_vm4, %v85_v19 }
 0x111   :  { %v124_v22 = vpop.f32.mrf.mxu2 }
 0x112   :  { %v125_v23 = vadd.f32 %v185_v21, %v124_v22 }
 0x114   :  { %v128_v25 = vmax.f32 %v125_v23, 0.0 }
 0x116   :  { %v130_v26 = vmul.f32 %v186_v24, %v128_v25 }
 0x118   :  { %138 = vrot.lane.b32.xlu0 %v130_v26, %s188_s10  ;;  %v132_v28 = vsel %vm131_vm5, %v130_v26, 0.0 }
 0x119   :  { %v126_v27 = vpop.f32.mrf.mxu2 }
 0x142   :  { %133 = vadd.xlane.f32.xlu0 %v132_v28 }
 0x18a   :  { %v139_v29 = vpop.permute.xlu0 %138 }
 0x18b   :  { %v141_v30 = vsel %vm131_vm5, %v139_v29, 0.0 }
 0x18c   :  { %142 = vadd.xlane.f32.xlu1 %v141_v30 }
 0x1b5   :  { %v134_v32 = vpop.xlane.xlu0 %133 }
 0x1b6   :  { %v136_v34 = vadd.f32 %v187_v31, %v134_v32 }
 0x1ff   :  { %v143_v33 = vpop.xlane.xlu1 %142 }
 0x200   :  { %v144_v35 = vadd.f32 %v187_v31, %v143_v33 }
 0x202   :  { %v146_v36 = vsel %vm145_vm6, %v136_v34, %v144_v35 }
 0x203   :  { %v148_v37 = vsel %vm147_vm7, %v146_v36, 0.0 }
 0x204   :  { %150 = vst.msk [vmem:[%s260_s4] sm:$0xff] %vm149_vm8, %v148_v37 }

</bundles_post_ra>
